<compile_context>
chip_gen: v7x
topology: tpu7x:2x2x1
jax: 0.10.0
libtpu: 0.0.40
codegen_flags: <defaults>
</compile_context>

<pallas_src>
import jax
import jax.numpy as jnp
from jax.experimental import pallas as pl
from jax.experimental.pallas import tpu as pltpu

D_IN = 64
D_H1 = 512
D_H2 = 256
D_OUT = 16
EPS = 1e-5


def classifier_kernel(x_ref, w1_ref, t1_ref, w2_ref, t2_ref, w3_ref, b3_ref,
                      o_ref):
    # Matmul operands in bf16 (MXU native); epilogue math in f32 (VPU-safe on
    # all of v5e/v6e/v7x).
    x = x_ref[...].astype(jnp.bfloat16)

    # Linear1 (BN6 scale folded into w1) + BN6 shift + leaky_relu(0.2)
    h1 = jnp.dot(x, w1_ref[...], preferred_element_type=jnp.float32)
    h1 = h1 + t1_ref[...]
    h1 = jnp.where(h1 > 0, h1, 0.2 * h1)
    # dp1: identity in eval mode

    # Linear2 (BN7 scale folded into w2, bias folded into t2) + leaky_relu
    h2 = jnp.dot(h1.astype(jnp.bfloat16), w2_ref[...],
                 preferred_element_type=jnp.float32)
    h2 = h2 + t2_ref[...]
    h2 = jnp.where(h2 > 0, h2, 0.2 * h2)
    # dp2: identity in eval mode

    # Linear3 (true 16-wide output; masked partial store accepted -- output
    # volume is tiny vs. the h1/h2 intermediates).
    y = jnp.dot(h2.astype(jnp.bfloat16), w3_ref[...],
                preferred_element_type=jnp.float32)
    o_ref[...] = (y + b3_ref[...]).astype(o_ref.dtype)


def classifier_forward(x, params, *, block_m=1024):
    """x: [B, D_IN] float32. Returns [B, D_OUT] float32."""
    B = x.shape[0]
    w1f, t1, w2f, t2, w3f, b3 = params

    # Batch tile: multiple of 8 sublanes (or the full batch if B < 8), capped
    # by block_m.  No padding of x -- the grid uses a ragged last tile.
    tm = min(block_m, max(8, -(-B // 8) * 8))
    n_tiles = pl.cdiv(B, tm)

    resident = lambda shape: pl.BlockSpec(shape, lambda i: (0, 0))

    flops = 2 * B * (D_IN * D_H1 + D_H1 * D_H2 + D_H2 * D_OUT)
    bytes_accessed = (
        B * D_IN * 4 + B * D_OUT * 4                        # x in, y out
        + (D_IN * D_H1 + D_H1 * D_H2 + D_H2 * D_OUT) * 2    # bf16 weights
        + (D_H1 + D_H2 + D_OUT) * 4)                        # affine vectors

    out = pl.pallas_call(
        classifier_kernel,
        out_shape=jax.ShapeDtypeStruct((B, D_OUT), jnp.float32),
        grid_spec=pl.GridSpec(
            grid=(n_tiles,),
            in_specs=[
                pl.BlockSpec((tm, D_IN), lambda i: (i, 0)),   # x: pipelined
                resident((D_IN, D_H1)),                       # w1 (bf16)
                resident((1, D_H1)),                          # t1
                resident((D_H1, D_H2)),                       # w2 (bf16)
                resident((1, D_H2)),                          # t2
                resident((D_H2, D_OUT)),                      # w3 (bf16)
                resident((1, D_OUT)),                         # b3
            ],
            out_specs=pl.BlockSpec((tm, D_OUT), lambda i: (i, 0)),
        ),
        compiler_params=pltpu.CompilerParams(
            dimension_semantics=("parallel",),
        ),
        cost_estimate=pl.CostEstimate(
            flops=flops, transcendentals=0, bytes_accessed=bytes_accessed),
    )(x, w1f, t1, w2f, t2, w3f, b3)

    return out


def make_params(key):
    """Deterministic synthetic parameters (PyTorch-shaped, then pre-folded)."""
    ks = jax.random.split(key, 12)

    # nn.Linear weights: (out_features, in_features)
    w1 = jax.random.normal(ks[0], (D_H1, D_IN), jnp.float32) * 0.05
    w2 = jax.random.normal(ks[1], (D_H2, D_H1), jnp.float32) * 0.05
    b2 = jax.random.normal(ks[2], (D_H2,), jnp.float32) * 0.05
    w3 = jax.random.normal(ks[3], (D_OUT, D_H2), jnp.float32) * 0.05
    b3 = jax.random.normal(ks[4], (D_OUT,), jnp.float32) * 0.05

    # BatchNorm1d params + running stats (eval mode)
    g6 = 1.0 + 0.1 * jax.random.normal(ks[5], (D_H1,), jnp.float32)
    be6 = 0.1 * jax.random.normal(ks[6], (D_H1,), jnp.float32)
    mu6 = 0.1 * jax.random.normal(ks[7], (D_H1,), jnp.float32)
    var6 = jnp.abs(1.0 + 0.1 * jax.random.normal(ks[8], (D_H1,), jnp.float32))

    g7 = 1.0 + 0.1 * jax.random.normal(ks[9], (D_H2,), jnp.float32)
    be7 = 0.1 * jax.random.normal(ks[10], (D_H2,), jnp.float32)
    mu7 = 0.1 * jax.random.normal(ks[11], (D_H2,), jnp.float32)
    var7 = jnp.abs(1.0 + 0.05 * mu7)  # deterministic, positive

    # Fold BN (eval): BN(z) = z*scale + shift, scale folded into weights (f32
    # fold, bf16 cast only at the end; tolerance depends on BN variance scale).
    s1 = g6 / jnp.sqrt(var6 + EPS)
    t1 = be6 - mu6 * s1
    s2 = g7 / jnp.sqrt(var7 + EPS)
    t2 = be7 + (b2 - mu7) * s2           # Linear2 bias folded into shift

    w1f = (w1.T * s1[None, :]).astype(jnp.bfloat16)      # (D_IN, D_H1)
    w2f = (w2.T * s2[None, :]).astype(jnp.bfloat16)      # (D_H1, D_H2)
    w3f = w3.T.astype(jnp.bfloat16)                      # (D_H2, D_OUT)

    params = (
        w1f, t1.reshape(1, D_H1),
        w2f, t2.reshape(1, D_H2),
        w3f, b3.reshape(1, D_OUT),
    )
    raw = (w1, w2, b2, w3, b3, g6, be6, mu6, var6, g7, be7, mu7, var7)
    return params, raw


def reference_forward(x, raw):
    """Pure-JAX f32 reference mirroring the PyTorch forward in eval mode."""
    (w1, w2, b2, w3, b3, g6, be6, mu6, var6, g7, be7, mu7, var7) = raw
    lrelu = lambda z: jnp.where(z > 0, z, 0.2 * z)
    h = x @ w1.T
    h = (h - mu6) / jnp.sqrt(var6 + EPS) * g6 + be6
    h = lrelu(h)
    h = h @ w2.T + b2
    h = (h - mu7) / jnp.sqrt(var7 + EPS) * g7 + be7
    h = lrelu(h)
    return h @ w3.T + b3


if __name__ == "__main__":
    key = jax.random.PRNGKey(0)
    kx, kx2, kx3, kp = jax.random.split(key, 4)
    params, raw = make_params(kp)

    # Test 1: single full tile.
    B = 8
    x = jax.random.normal(kx, (B, D_IN), jnp.float32)
    out = jax.block_until_ready(classifier_forward(x, params))
    ref = reference_forward(x, raw)
    assert out.shape == (B, D_OUT)
    # bf16 weights inside the kernel -> bf16-appropriate tolerance vs f32 ref.
    assert jnp.allclose(out, ref, atol=2e-2, rtol=2e-2), (
        f"max abs err {jnp.max(jnp.abs(out - ref))}"
    )

    # Test 2: multi-tile grid with a ragged last tile (50 = 3*16 + 2 rows).
    B2 = 50
    x2 = jax.random.normal(kx2, (B2, D_IN), jnp.float32)
    out2 = jax.block_until_ready(classifier_forward(x2, params, block_m=16))
    ref2 = reference_forward(x2, raw)
    assert out2.shape == (B2, D_OUT)
    assert jnp.allclose(out2, ref2, atol=2e-2, rtol=2e-2), (
        f"max abs err {jnp.max(jnp.abs(out2 - ref2))}"
    )

    # Test 3: tiny batch (< 8 sublanes) exercises the B < tile path.
    B3 = 2
    x3 = jax.random.normal(kx3, (B3, D_IN), jnp.float32)
    out3 = jax.block_until_ready(classifier_forward(x3, params))
    ref3 = reference_forward(x3, raw)
    assert out3.shape == (B3, D_OUT)
    assert jnp.allclose(out3, ref3, atol=2e-2, rtol=2e-2), (
        f"max abs err {jnp.max(jnp.abs(out3 - ref3))}"
    )

    print("KERNEL_OK")
</pallas_src>

<mosaic_0001>
module attributes {stable_mosaic.version = 11 : i64} {
  func.func @classifier_kernel(%arg0: i32, %arg1: memref<8x64xf32, #tpu.memory_space<vmem>>, %arg2: memref<64x512xbf16, #tpu.memory_space<vmem>>, %arg3: memref<1x512xf32, #tpu.memory_space<vmem>>, %arg4: memref<512x256xbf16, #tpu.memory_space<vmem>>, %arg5: memref<1x256xf32, #tpu.memory_space<vmem>>, %arg6: memref<256x16xbf16, #tpu.memory_space<vmem>>, %arg7: memref<1x16xf32, #tpu.memory_space<vmem>>, %arg8: memref<8x16xf32, #tpu.memory_space<vmem>>) attributes {dimension_semantics = [#tpu.dimension_semantics<parallel>], iteration_bounds = array<i64: 1>, scalar_prefetch = 0 : i64, scratch_operands = 0 : i64, tpu.core_type = #tpu.core_type<tc>, window_params = [{transform_indices = @transform_0, window_bounds = array<i64: 8, 64>}, {pipeline_mode = #tpu.pipeline_mode<synchronous>, transform_indices = @transform_1, window_bounds = array<i64: 64, 512>}, {pipeline_mode = #tpu.pipeline_mode<synchronous>, transform_indices = @transform_2, window_bounds = array<i64: 1, 512>}, {pipeline_mode = #tpu.pipeline_mode<synchronous>, transform_indices = @transform_3, window_bounds = array<i64: 512, 256>}, {pipeline_mode = #tpu.pipeline_mode<synchronous>, transform_indices = @transform_4, window_bounds = array<i64: 1, 256>}, {pipeline_mode = #tpu.pipeline_mode<synchronous>, transform_indices = @transform_5, window_bounds = array<i64: 256, 16>}, {pipeline_mode = #tpu.pipeline_mode<synchronous>, transform_indices = @transform_6, window_bounds = array<i64: 1, 16>}, {transform_indices = @transform_7, window_bounds = array<i64: 8, 16>}]} {
    %c0 = arith.constant 0 : index
    %c0_0 = arith.constant 0 : index
    %0 = vector.load %arg1[%c0, %c0_0] : memref<8x64xf32, #tpu.memory_space<vmem>>, vector<8x64xf32>
    %1 = arith.truncf %0 : vector<8x64xf32> to vector<8x64xbf16>
    %c0_1 = arith.constant 0 : index
    %c0_2 = arith.constant 0 : index
    %2 = vector.load %arg2[%c0_1, %c0_2] : memref<64x512xbf16, #tpu.memory_space<vmem>>, vector<64x512xbf16>
    %cst = arith.constant dense<0.000000e+00> : vector<8x512xf32>
    %3 = tpu.matmul %1, %2, %cst {dimension_numbers = #tpu.dot_dimension_numbers<[1], [0], [0], [1], [0, 0, 1, 1], [], []>} : vector<8x64xbf16>, vector<64x512xbf16>, vector<8x512xf32> -> vector<8x512xf32>
    %c0_3 = arith.constant 0 : index
    %c0_4 = arith.constant 0 : index
    %4 = vector.load %arg3[%c0_3, %c0_4] : memref<1x512xf32, #tpu.memory_space<vmem>>, vector<1x512xf32>
    %5 = vector.broadcast %4 : vector<1x512xf32> to vector<8x512xf32>
    %6 = arith.addf %3, %5 : vector<8x512xf32>
    %cst_5 = arith.constant 0.000000e+00 : f32
    %7 = vector.broadcast %cst_5 : f32 to vector<8x512xf32>
    %8 = arith.cmpf ogt, %6, %7 : vector<8x512xf32>
    %cst_6 = arith.constant 2.000000e-01 : f32
    %9 = vector.broadcast %cst_6 : f32 to vector<8x512xf32>
    %10 = arith.mulf %9, %6 : vector<8x512xf32>
    %11 = arith.select %8, %6, %10 : vector<8x512xi1>, vector<8x512xf32>
    %12 = arith.truncf %11 : vector<8x512xf32> to vector<8x512xbf16>
    %c0_7 = arith.constant 0 : index
    %c0_8 = arith.constant 0 : index
    %13 = vector.load %arg4[%c0_7, %c0_8] : memref<512x256xbf16, #tpu.memory_space<vmem>>, vector<512x256xbf16>
    %cst_9 = arith.constant dense<0.000000e+00> : vector<8x256xf32>
    %14 = tpu.matmul %12, %13, %cst_9 {dimension_numbers = #tpu.dot_dimension_numbers<[1], [0], [0], [1], [0, 0, 1, 1], [], []>} : vector<8x512xbf16>, vector<512x256xbf16>, vector<8x256xf32> -> vector<8x256xf32>
    %c0_10 = arith.constant 0 : index
    %c0_11 = arith.constant 0 : index
    %15 = vector.load %arg5[%c0_10, %c0_11] : memref<1x256xf32, #tpu.memory_space<vmem>>, vector<1x256xf32>
    %16 = vector.broadcast %15 : vector<1x256xf32> to vector<8x256xf32>
    %17 = arith.addf %14, %16 : vector<8x256xf32>
    %cst_12 = arith.constant 0.000000e+00 : f32
    %18 = vector.broadcast %cst_12 : f32 to vector<8x256xf32>
    %19 = arith.cmpf ogt, %17, %18 : vector<8x256xf32>
    %cst_13 = arith.constant 2.000000e-01 : f32
    %20 = vector.broadcast %cst_13 : f32 to vector<8x256xf32>
    %21 = arith.mulf %20, %17 : vector<8x256xf32>
    %22 = arith.select %19, %17, %21 : vector<8x256xi1>, vector<8x256xf32>
    %23 = arith.truncf %22 : vector<8x256xf32> to vector<8x256xbf16>
    %c0_14 = arith.constant 0 : index
    %c0_15 = arith.constant 0 : index
    %24 = vector.load %arg6[%c0_14, %c0_15] : memref<256x16xbf16, #tpu.memory_space<vmem>>, vector<256x16xbf16>
    %cst_16 = arith.constant dense<0.000000e+00> : vector<8x16xf32>
    %25 = tpu.matmul %23, %24, %cst_16 {dimension_numbers = #tpu.dot_dimension_numbers<[1], [0], [0], [1], [0, 0, 1, 1], [], []>} : vector<8x256xbf16>, vector<256x16xbf16>, vector<8x16xf32> -> vector<8x16xf32>
    %c0_17 = arith.constant 0 : index
    %c0_18 = arith.constant 0 : index
    %26 = vector.load %arg7[%c0_17, %c0_18] : memref<1x16xf32, #tpu.memory_space<vmem>>, vector<1x16xf32>
    %27 = vector.broadcast %26 : vector<1x16xf32> to vector<8x16xf32>
    %28 = arith.addf %25, %27 : vector<8x16xf32>
    %c0_19 = arith.constant 0 : index
    %c0_20 = arith.constant 0 : index
    %29 = vector.load %arg8[%c0_19, %c0_20] : memref<8x16xf32, #tpu.memory_space<vmem>>, vector<8x16xf32>
    tpu.vector_store %arg8[%c0_19, %c0_20], %28 {strides = array<i32>} : memref<8x16xf32, #tpu.memory_space<vmem>>, vector<8x16xf32>,
    return
  }
  func.func @transform_0(%arg0: i32) -> (i32, i32) {
    %c0_i32 = arith.constant 0 : i32
    %c0_i32_0 = arith.constant 0 : i32
    return %arg0, %c0_i32 : i32, i32
  }
  func.func @transform_1(%arg0: i32) -> (i32, i32) {
    %c0_i32 = arith.constant 0 : i32
    %c0_i32_0 = arith.constant 0 : i32
    %c0_i32_1 = arith.constant 0 : i32
    return %c0_i32, %c0_i32_0 : i32, i32
  }
  func.func @transform_2(%arg0: i32) -> (i32, i32) {
    %c0_i32 = arith.constant 0 : i32
    %c0_i32_0 = arith.constant 0 : i32
    %c0_i32_1 = arith.constant 0 : i32
    return %c0_i32, %c0_i32_0 : i32, i32
  }
  func.func @transform_3(%arg0: i32) -> (i32, i32) {
    %c0_i32 = arith.constant 0 : i32
    %c0_i32_0 = arith.constant 0 : i32
    %c0_i32_1 = arith.constant 0 : i32
    return %c0_i32, %c0_i32_0 : i32, i32
  }
  func.func @transform_4(%arg0: i32) -> (i32, i32) {
    %c0_i32 = arith.constant 0 : i32
    %c0_i32_0 = arith.constant 0 : i32
    %c0_i32_1 = arith.constant 0 : i32
    return %c0_i32, %c0_i32_0 : i32, i32
  }
  func.func @transform_5(%arg0: i32) -> (i32, i32) {
    %c0_i32 = arith.constant 0 : i32
    %c0_i32_0 = arith.constant 0 : i32
    %c0_i32_1 = arith.constant 0 : i32
    return %c0_i32, %c0_i32_0 : i32, i32
  }
  func.func @transform_6(%arg0: i32) -> (i32, i32) {
    %c0_i32 = arith.constant 0 : i32
    %c0_i32_0 = arith.constant 0 : i32
    %c0_i32_1 = arith.constant 0 : i32
    return %c0_i32, %c0_i32_0 : i32, i32
  }
  func.func @transform_7(%arg0: i32) -> (i32, i32) {
    %c0_i32 = arith.constant 0 : i32
    %c0_i32_0 = arith.constant 0 : i32
    return %arg0, %c0_i32 : i32, i32
  }
}

</mosaic_0001>

<bundles_post_ra>
// kernel: tpu_custom_call.1
= control target key start
LH: loop header
LB: loop body
LE: loop exit
PB: predicated region body
PF: predicated region fallthrough
CT: control target
= control target key end

     0   :  { %12 = vsyncpa [#allocation3], 0  ;;  %s1449_s0 = inlined_call_operand.vmem [shape: f32[8,64], index: 0, kind: input, shape index: {}]   ;;  %s1450_s1 = inlined_call_operand.vmem [shape: bf16[64,512], index: 1, kind: input, shape index: {}]   ;;  %s1451_s2 = inlined_call_operand.vmem [shape: f32[1,512], index: 2, kind: input, shape index: {}]   ;;  %s1452_s3 = inlined_call_operand.hbm [shape: bf16[512,256], index: 3, kind: input, shape index: {}]   ;;  %s1453_s4 = inlined_call_operand.vmem [shape: f32[1,256], index: 4, kind: input, shape index: {}]   ;;  %s1454_s5 = inlined_call_operand.vmem [shape: bf16[256,16], index: 5, kind: input, shape index: {}]   ;;  %s1455_s6 = inlined_call_operand.vmem [shape: f32[1,16], index: 6, kind: input, shape index: {}]   ;;  %s1456_s7 = inlined_call_operand.hbm [shape: f32[8,16], index: 7, kind: output, shape index: {}]  }
   0x1   :  { %13 = vsyncpa [#allocation4], 0  ;;  %s1256_s24 = smov [#allocation2]   ;;  %s1208_s28 = scalar_lea.hbm %s1452_s3, 8192 }
   0x2   :  { %s25_s25 = sshll.u32 %s1256_s24, 4  ;;  %p1209_p0 = scmp.ne.s32.totalorder %s1452_s3, %s1208_s28  ;;  %s26_s25 = int_to_ptr.vmem [resolvable:$true] %s25_s25 }
   0x3   :  { %p1212_p1 = scmp.lt.u32.totalorder %s1208_s28, %s1452_s3 }
   0x5   :  { %p1214_p2 = pnand %p1212_p1, %p1209_p0 }
   0x7   :  { %1217 = shalt.err (!%p1214_p2)
}
   0x8   :  { %s1218_s10 = scalar_lea.vmem %s26_s25, 8192  ;;  %p1223_p4 = scmp.lt.s32.totalorder %s26_s25, %s26_s25 }
   0x9   :  { %p1219_p3 = scmp.ne.s32.totalorder %s26_s25, %s1218_s10  ;;  %p1224_p5 = scmp.lt.s32.totalorder %s1218_s10, %s1218_s10 }
   0xb   :  { %p1225_p6 = por %p1224_p5, %p1223_p4 }
   0xd   :  { %p1226_p7 = pnand %p1225_p6, %p1219_p3 }
   0xf   :  { %1229 = shalt.err (!%p1226_p7)
}
  0x10   :  { %s1257_s11 = smov 128   ;;  %s1258_s12 = smov 8  }
  0x11   :  { %31 = dma.hbm_to_vmem [thread:$0]  %s1452_s3, 8192, %s26_s25, [#allocation3], %s1257_s11, %s1257_s11, %s1258_s12  }
  0x12   :  { %1252 = dma.done.wait [#allocation3], 8192  }
  0x13   :  { %1253 = vsyncadd [#allocation3], 4294959104  ;;  %v1259_v0 = vmov 0   ;;  %v1072_v1 = vld [vmem:[%s1450_s1 + $0x4] ss:$16 sps:$4 sm:$0xff]   ;;  %vm162_vm0 = vcmask 523264  }
  0x14   :  { %198 = vmatprep.mubr.bf16.mxu0 %v1259_v0  ;;  %v1074_v2 = vld [vmem:[%s1450_s1] ss:$16 sps:$4 sm:$0xff]   ;;  %166 = vmatprep.subr.bf16.mxu0 %v1072_v1  ;;  %v1075_v3 = vld [vmem:[%s1450_s1 + $0x24] ss:$16 sps:$4 sm:$0xff]   ;;  %v1086_v10 = vld [vmem:[%s1450_s1 + $0xc] ss:$16 sps:$4 sm:$0xff]  }
  0x15   :  { %167 = vmatpush1.bf16.msra.mxu0 %v1074_v2  ;;  %v1077_v4 = vld [vmem:[%s1450_s1 + $0x20] ss:$16 sps:$4 sm:$0xff]   ;;  %v1078_v5 = vld [vmem:[%s1450_s1 + $0x44] ss:$16 sps:$4 sm:$0xff]   ;;  %v1084_v15 = vld [vmem:[%s1450_s1 + $0x8] ss:$16 sps:$4 sm:$0xff]  }
  0x16   :  { %168 = vmatprep.subr.bf16.mxu0 %v1075_v3  ;;  %v1080_v6 = vld [vmem:[%s1450_s1 + $0x40] ss:$16 sps:$4 sm:$0xff]   ;;  %v1081_v7 = vld [vmem:[%s1450_s1 + $0x64] ss:$16 sps:$4 sm:$0xff]   ;;  %v1089_v17 = vld [vmem:[%s1450_s1 + $0x2c] ss:$16 sps:$4 sm:$0xff]  }
  0x17   :  { %v1083_v8 = vld [vmem:[%s1450_s1 + $0x60] ss:$16 sps:$4 sm:$0xff]   ;;  %v1096_v11 = vld [vmem:[#allocation2 + $0x4] ss:$8 sps:$4 sm:$0xff]   ;;  %v1099_v13 = vld [vmem:[#allocation2 + $0x14] ss:$8 sps:$4 sm:$0xff]  }
  0x18   :  { %v42_v9 = vld [vmem:[%s1449_s0] sm:$0xff]  ;;  %660 = vmatprep.subr.bf16.mxu1 %v1096_v11  ;;  %v1101_v16 = vld [vmem:[#allocation2 + $0x10] ss:$8 sps:$4 sm:$0xff]   ;;  %v1105_v21 = vld [vmem:[#allocation2 + $0x34] ss:$8 sps:$4 sm:$0xff]   ;;  %s1260_s30 = smov [#allocation5]  }
  0x19   :  { %169 = vmatpush1.bf16.msra.mxu0 %v1077_v4  ;;  %v1098_v12 = vld [vmem:[#allocation2] ss:$8 sps:$4 sm:$0xff]   ;;  %v43_v14 = vpack.c.bf16 %v42_v9, %v42_v9  ;;  %v1102_v18 = vld [vmem:[#allocation2 + $0x24] ss:$8 sps:$4 sm:$0xff]   ;;  %v1107_v23 = vld [vmem:[#allocation2 + $0x30] ss:$8 sps:$4 sm:$0xff]  }
  0x1a   :  { %170 = vmatprep.subr.bf16.mxu0 %v1078_v5  ;;  %661 = vmatpush1.bf16.msra.mxu1 %v1098_v12  ;;  %v1087_v19 = vld [vmem:[%s1450_s1 + $0x28] ss:$16 sps:$4 sm:$0xff]   ;;  %v1092_v22 = vld [vmem:[%s1450_s1 + $0x4c] ss:$16 sps:$4 sm:$0xff]   ;;  %s933_s8 = sshll.u32 %s1260_s30, 4  ;;  %vm925_vm7 = vcmask 130048   ;;  %s934_s8 = int_to_ptr.vmem [resolvable:$true] %s933_s8 }
  0x1b   :  { %662 = vmatprep.subr.bf16.mxu1 %v1099_v13  ;;  %v1104_v20 = vld [vmem:[#allocation2 + $0x20] ss:$8 sps:$4 sm:$0xff]   ;;  %v1108_v25 = vld [vmem:[#allocation2 + $0x44] ss:$8 sps:$4 sm:$0xff]   ;;  %v1114_v29 = vld [vmem:[#allocation2 + $0x54] ss:$8 sps:$4 sm:$0xff]   ;;  %p1235_p9 = scmp.lt.s32.totalorder %s934_s8, %s934_s8 }
  0x1c   :  { %v1090_v24 = vld [vmem:[%s1450_s1 + $0x48] ss:$16 sps:$4 sm:$0xff]   ;;  %v1095_v26 = vld [vmem:[%s1450_s1 + $0x6c] ss:$16 sps:$4 sm:$0xff]   ;;  %s1230_s9 = scalar_lea.vmem %s934_s8, 128 }
  0x1d   :  { %171 = vmatpush1.bf16.msra.mxu0 %v1080_v6  ;;  %v1093_v27 = vld [vmem:[%s1450_s1 + $0x68] ss:$16 sps:$4 sm:$0xff]   ;;  %v1112_v30 = vld [vmem:[#allocation2 + $0x104] ss:$8 sps:$4 sm:$0xff]   ;;  %v1118_v34 = vld [vmem:[#allocation2 + $0x114] ss:$8 sps:$4 sm:$0xff]   ;;  %p1231_p8 = scmp.ne.s32.totalorder %s934_s8, %s1230_s9  ;;  %p1236_p10 = scmp.lt.s32.totalorder %s1230_s9, %s1230_s9 }
  0x1e   :  { %172 = vmatprep.subr.bf16.mxu0 %v1081_v7  ;;  %663 = vmatpush1.bf16.msra.mxu1 %v1101_v16  ;;  %v1113_v28 = vld [vmem:[#allocation2 + $0x40] ss:$8 sps:$4 sm:$0xff]   ;;  %v1119_v31 = vld [vmem:[#allocation2 + $0x50] ss:$8 sps:$4 sm:$0xff]   ;;  %v1120_v33 = vld [vmem:[#allocation2 + $0x64] ss:$8 sps:$4 sm:$0xff]  }
  0x1f   :  { %664 = vmatprep.subr.bf16.mxu1 %v1102_v18  ;;  %v1110_v32 = vld [vmem:[#allocation2 + $0x100] ss:$8 sps:$4 sm:$0xff]   ;;  %v1116_v35 = vld [vmem:[#allocation2 + $0x110] ss:$8 sps:$4 sm:$0xff]   ;;  %v1126_v37 = vld [vmem:[#allocation2 + $0x74] ss:$8 sps:$4 sm:$0xff]   ;;  %p1237_p11 = por %p1236_p10, %p1235_p9 }
  0x20   :  { %v1125_v36 = vld [vmem:[#allocation2 + $0x60] ss:$8 sps:$4 sm:$0xff]   ;;  %v1124_v38 = vld [vmem:[#allocation2 + $0x124] ss:$8 sps:$4 sm:$0xff]   ;;  %v1131_v39 = vld [vmem:[#allocation2 + $0x70] ss:$8 sps:$4 sm:$0xff]  }
  0x21   :  { %173 = vmatpush1.bf16.msra.mxu0 %v1083_v8  ;;  %v1122_v40 = vld [vmem:[#allocation2 + $0x120] ss:$8 sps:$4 sm:$0xff]   ;;  %v1132_v41 = vld [vmem:[#allocation2 + $0x84] ss:$8 sps:$4 sm:$0xff]   ;;  %v1130_v42 = vld [vmem:[#allocation2 + $0x134] ss:$8 sps:$4 sm:$0xff]   ;;  %p1238_p12 = pnand %p1237_p11, %p1231_p8 }
  0x22   :  { %207 = vmatprep.subr.bf16.mxu0 %v1086_v10  ;;  %665 = vmatpush1.bf16.msra.mxu1 %v1104_v20  ;;  %v1128_v43 = vld [vmem:[#allocation2 + $0x130] ss:$8 sps:$4 sm:$0xff]   ;;  %v1136_v44 = vld [vmem:[#allocation2 + $0x144] ss:$8 sps:$4 sm:$0xff]   ;;  %v1137_v45 = vld [vmem:[#allocation2 + $0x80] ss:$8 sps:$4 sm:$0xff]   ;;  %v62_v20 = vlaneseq }
  0x23   :  { %666 = vmatprep.subr.bf16.mxu1 %v1105_v21  ;;  %v1138_v46 = vld [vmem:[#allocation2 + $0x94] ss:$8 sps:$4 sm:$0xff]   ;;  %v1143_v47 = vld [vmem:[#allocation2 + $0x90] ss:$8 sps:$4 sm:$0xff]   ;;  %v1134_v48 = vld [vmem:[#allocation2 + $0x140] ss:$8 sps:$4 sm:$0xff]  }
  0x24   :  { %958 = vmatmul.mubr.msk.bf16.vlgmr.msra.gmra.mrb[0].mxu0 %vm162_vm0, %v43_v14  ;;  %v1144_v49 = vld [vmem:[#allocation2 + $0xa4] ss:$8 sps:$4 sm:$0xff]   ;;  %v1142_v50 = vld [vmem:[#allocation2 + $0x154] ss:$8 sps:$4 sm:$0xff]   ;;  %v1149_v51 = vld [vmem:[#allocation2 + $0xa0] ss:$8 sps:$4 sm:$0xff]  }
  0x25   :  { %208 = vmatpush1.bf16.msra.mxu0 %v1084_v15  ;;  %239 = vmatprep.mubr.bf16.mxu0 %v1259_v0  ;;  %v1140_v52 = vld [vmem:[#allocation2 + $0x150] ss:$8 sps:$4 sm:$0xff]   ;;  %v1150_v53 = vld [vmem:[#allocation2 + $0xb4] ss:$8 sps:$4 sm:$0xff]   ;;  %v1148_v54 = vld [vmem:[#allocation2 + $0x164] ss:$8 sps:$4 sm:$0xff]  }
  0x26   :  { %209 = vmatprep.subr.bf16.mxu0 %v1089_v17  ;;  %667 = vmatpush1.bf16.msra.mxu1 %v1107_v23  ;;  %v1155_v55 = vld [vmem:[#allocation2 + $0xb0] ss:$8 sps:$4 sm:$0xff]   ;;  %v1146_v56 = vld [vmem:[#allocation2 + $0x160] ss:$8 sps:$4 sm:$0xff]   ;;  %v1156_v57 = vld [vmem:[#allocation2 + $0xc4] ss:$8 sps:$4 sm:$0xff]  }
  0x27   :  { %668 = vmatprep.subr.bf16.mxu1 %v1108_v25  ;;  %v1154_v58 = vld [vmem:[#allocation2 + $0x174] ss:$8 sps:$4 sm:$0xff]   ;;  %v1161_v59 = vld [vmem:[#allocation2 + $0xc0] ss:$8 sps:$4 sm:$0xff]   ;;  %v1152_v60 = vld [vmem:[#allocation2 + $0x170] ss:$8 sps:$4 sm:$0xff]  }
  0x28   :  { %v1162_v61 = vld [vmem:[#allocation2 + $0xd4] ss:$8 sps:$4 sm:$0xff]   ;;  %v1160_v62 = vld [vmem:[#allocation2 + $0x184] ss:$8 sps:$4 sm:$0xff]   ;;  %v1167_v63 = vld [vmem:[#allocation2 + $0xd0] ss:$8 sps:$4 sm:$0xff]  }
  0x29   :  { %210 = vmatpush1.bf16.msra.mxu0 %v1087_v19  ;;  %v1158_v0 = vld [vmem:[#allocation2 + $0x180] ss:$8 sps:$4 sm:$0xff]   ;;  %v1166_v1 = vld [vmem:[#allocation2 + $0x194] ss:$8 sps:$4 sm:$0xff]   ;;  %v1164_v2 = vld [vmem:[#allocation2 + $0x190] ss:$8 sps:$4 sm:$0xff]  }
  0x2a   :  { %211 = vmatprep.subr.bf16.mxu0 %v1092_v22  ;;  %669 = vmatpush1.bf16.msra.mxu1 %v1113_v28  ;;  %v1168_v3 = vld [vmem:[#allocation2 + $0xe4] ss:$8 sps:$4 sm:$0xff]   ;;  %v1170_v5 = vld [vmem:[#allocation2 + $0x1a0] ss:$8 sps:$4 sm:$0xff]   ;;  %v1174_v7 = vld [vmem:[#allocation2 + $0xf4] ss:$8 sps:$4 sm:$0xff]  }
  0x2b   :  { %670 = vmatprep.subr.bf16.mxu1 %v1114_v29  ;;  %v1172_v4 = vld [vmem:[#allocation2 + $0x1a4] ss:$8 sps:$4 sm:$0xff]   ;;  %v1173_v6 = vld [vmem:[#allocation2 + $0xe0] ss:$8 sps:$4 sm:$0xff]   ;;  %v1176_v8 = vld [vmem:[#allocation2 + $0x1b0] ss:$8 sps:$4 sm:$0xff]  }
  0x2c   :  { %v1178_v9 = vld [vmem:[#allocation2 + $0x1b4] ss:$8 sps:$4 sm:$0xff]   ;;  %v1179_v10 = vld [vmem:[#allocation2 + $0xf0] ss:$8 sps:$4 sm:$0xff]   ;;  %v1182_v11 = vld [vmem:[#allocation2 + $0x1c4] ss:$8 sps:$4 sm:$0xff]  }
  0x2d   :  { %212 = vmatpush1.bf16.msra.mxu0 %v1090_v24  ;;  %v1180_v12 = vld [vmem:[#allocation2 + $0x1c0] ss:$8 sps:$4 sm:$0xff]   ;;  %v1185_v13 = vld [vmem:[#allocation2 + $0x1d4] ss:$8 sps:$4 sm:$0xff]   ;;  %v1188_v15 = vld [vmem:[#allocation2 + $0x1e4] ss:$8 sps:$4 sm:$0xff]  }
  0x2e   :  { %213 = vmatprep.subr.bf16.mxu0 %v1095_v26  ;;  %671 = vmatpush1.bf16.msra.mxu1 %v1119_v31  ;;  %v1186_v16 = vld [vmem:[#allocation2 + $0x1e0] ss:$8 sps:$4 sm:$0xff]   ;;  %v1191_v17 = vld [vmem:[#allocation2 + $0x1f4] ss:$8 sps:$4 sm:$0xff]   ;;  %v1189_v18 = vld [vmem:[#allocation2 + $0x1f0] ss:$8 sps:$4 sm:$0xff]  }
  0x2f   :  { %672 = vmatprep.subr.bf16.mxu1 %v1120_v33  ;;  %v1192_v19 = vld [vmem:[%s1454_s5 + $0x40] sm:$0xff]   ;;  %v1369_v21 = vshrl.u32 %v62_v20, 7 }
  0x30   :  { %v60_v23 = vld [vmem:[%s1451_s2] sm:$0xf] }
  0x31   :  { %214 = vmatpush1.bf16.msra.mxu0 %v1093_v27  ;;  %v64_v22 = vsub.s32 0, %v1369_v21  ;;  %v68_v24 = vsub.s32 1, %v1369_v21 }
  0x32   :  { %701 = vmatprep.subr.bf16.mxu0 %v1112_v30  ;;  %673 = vmatpush1.bf16.msra.mxu1 %v1125_v36 }
  0x33   :  { %674 = vmatprep.subr.bf16.mxu1 %v1126_v37  ;;  %v65_v25 = vrot.slane %v60_v23, %v64_v22  ;;  %v69_v26 = vrot.slane %v60_v23, %v68_v24 }
  0x34   :  { %959 = vmatmul.mubr.msk.bf16.vlgmr.msra.gmra.mrb[4].mxu0 %vm162_vm0, %v43_v14  ;;  %v1183_v14 = vld [vmem:[#allocation2 + $0x1d0] ss:$8 sps:$4 sm:$0xff]  }
  0x35   :  { %702 = vmatpush1.bf16.msra.mxu0 %v1110_v32 }
  0x36   :  { %703 = vmatprep.subr.bf16.mxu0 %v1118_v34  ;;  %675 = vmatpush1.bf16.msra.mxu1 %v1131_v39 }
  0x37   :  { %676 = vmatprep.subr.bf16.mxu1 %v1132_v41  ;;  %v72_v41 = vsub.s32 2, %v1369_v21 }
  0x39   :  { %704 = vmatpush1.bf16.msra.mxu0 %v1116_v35 }
  0x3a   :  { %705 = vmatprep.subr.bf16.mxu0 %v1124_v38  ;;  %677 = vmatpush1.bf16.msra.mxu1 %v1137_v45  ;;  %v1193_v38 = vld [vmem:[%s1454_s5] sm:$0xff]  }
  0x3b   :  { %678 = vmatprep.subr.bf16.mxu1 %v1138_v46 }
  0x3d   :  { %706 = vmatpush1.bf16.msra.mxu0 %v1122_v40  ;;  %v1194_v40 = vld [vmem:[%s1454_s5 + $0x48] sm:$0xff]  }
  0x3e   :  { %707 = vmatprep.subr.bf16.mxu0 %v1130_v42  ;;  %679 = vmatpush1.bf16.msra.mxu1 %v1143_v47  ;;  %v76_v42 = vsub.s32 3, %v1369_v21 }
  0x3f   :  { %680 = vmatprep.subr.bf16.mxu1 %v1144_v49 }
  0x40   :  { %v77_v45 = vrot.slane %v60_v23, %v76_v42 }
  0x41   :  { %708 = vmatpush1.bf16.msra.mxu0 %v1128_v43  ;;  %v1195_v43 = vld [vmem:[%s1454_s5 + $0x8] sm:$0xff]  }
  0x42   :  { %709 = vmatprep.subr.bf16.mxu0 %v1136_v44  ;;  %681 = vmatpush1.bf16.msra.mxu1 %v1149_v51  ;;  %v73_v44 = vrot.slane %v60_v23, %v72_v41 }
  0x43   :  { %682 = vmatprep.subr.bf16.mxu1 %v1150_v53 }
  0x45   :  { %710 = vmatpush1.bf16.msra.mxu0 %v1134_v48 }
  0x46   :  { %711 = vmatprep.subr.bf16.mxu0 %v1142_v50  ;;  %683 = vmatpush1.bf16.msra.mxu1 %v1155_v55 }
  0x47   :  { %684 = vmatprep.subr.bf16.mxu1 %v1156_v57 }
  0x49   :  { %712 = vmatpush1.bf16.msra.mxu0 %v1140_v52 }
  0x4a   :  { %713 = vmatprep.subr.bf16.mxu0 %v1148_v54  ;;  %685 = vmatpush1.bf16.msra.mxu1 %v1161_v59  ;;  %v1197_v59 = vld [vmem:[%s1454_s5 + $0x10] sm:$0xff]  }
  0x4b   :  { %686 = vmatprep.subr.bf16.mxu1 %v1162_v61  ;;  %v1199_v61 = vld [vmem:[%s1454_s5 + $0x18] sm:$0xff]  }
  0x4d   :  { %714 = vmatpush1.bf16.msra.mxu0 %v1146_v56 }
  0x4e   :  { %715 = vmatprep.subr.bf16.mxu0 %v1154_v58  ;;  %687 = vmatpush1.bf16.msra.mxu1 %v1167_v63  ;;  %v1196_v58 = vld [vmem:[%s1454_s5 + $0x50] sm:$0xff]   ;;  %v1201_v63 = vld [vmem:[%s1454_s5 + $0x20] sm:$0xff]  }
  0x4f   :  { %688 = vmatprep.subr.bf16.mxu1 %v1168_v3  ;;  %v1205_v3 = vld [vmem:[%s1454_s5 + $0x30] sm:$0xff]  }
  0x51   :  { %716 = vmatpush1.bf16.msra.mxu0 %v1152_v60  ;;  %v1198_v60 = vld [vmem:[%s1454_s5 + $0x58] sm:$0xff]  }
  0x52   :  { %717 = vmatprep.subr.bf16.mxu0 %v1160_v62  ;;  %689 = vmatpush1.bf16.msra.mxu1 %v1173_v6  ;;  %v1200_v62 = vld [vmem:[%s1454_s5 + $0x60] sm:$0xff]  }
  0x53   :  { %690 = vmatprep.subr.bf16.mxu1 %v1174_v7 }
  0x55   :  { %718 = vmatpush1.bf16.msra.mxu0 %v1158_v0  ;;  %v1202_v0 = vld [vmem:[%s1454_s5 + $0x68] sm:$0xff]  }
  0x56   :  { %719 = vmatprep.subr.bf16.mxu0 %v1166_v1  ;;  %691 = vmatpush1.bf16.msra.mxu1 %v1179_v10  ;;  %v1203_v1 = vld [vmem:[%s1454_s5 + $0x28] sm:$0xff]   ;;  %v328_v10 = vld [vmem:[%s1453_s4] sm:$0x3] }
  0x57   :  { %1041 = vmatprep.subr.bf16.mxu1 %v1192_v19 }
  0x59   :  { %720 = vmatpush1.bf16.msra.mxu0 %v1164_v2  ;;  %v1204_v2 = vld [vmem:[%s1454_s5 + $0x70] sm:$0xff]  }
  0x5a   :  { %721 = vmatprep.subr.bf16.mxu0 %v1172_v4  ;;  %v1206_v4 = vld [vmem:[%s1454_s5 + $0x78] sm:$0xff]  }
  0x5d   :  { %722 = vmatpush1.bf16.msra.mxu0 %v1170_v5  ;;  %v1207_v5 = vld [vmem:[%s1454_s5 + $0x38] sm:$0xff]  }
  0x5e   :  { %723 = vmatprep.subr.bf16.mxu0 %v1178_v9 }
  0x61   :  { %724 = vmatpush1.bf16.msra.mxu0 %v1176_v8 }
  0x62   :  { %725 = vmatprep.subr.bf16.mxu0 %v1182_v11  ;;  %v333_v11 = vrot.slane %v328_v10, %v64_v22  ;;  %v1024_v22 = vld [vmem:[%s1455_s6] ss:$0 sm:$0xff] }
  0x65   :  { %726 = vmatpush1.bf16.msra.mxu0 %v1180_v12  ;;  %v337_v12 = vrot.slane %v328_v10, %v68_v24 }
  0x66   :  { %727 = vmatprep.subr.bf16.mxu0 %v1185_v13 }
  0x69   :  { %728 = vmatpush1.bf16.msra.mxu0 %v1183_v14 }
  0x6a   :  { %729 = vmatprep.subr.bf16.mxu0 %v1188_v15 }
  0x6d   :  { %730 = vmatpush1.bf16.msra.mxu0 %v1186_v16 }
  0x6e   :  { %731 = vmatprep.subr.bf16.mxu0 %v1191_v17 }
  0x71   :  { %732 = vmatpush1.bf16.msra.mxu0 %v1189_v18 }
  0xf7   :  { %v200_v27 = vpop.f32.mrb[0].mxu0 }
  0xf8   :  { %v201_v28 = vadd.f32 %v200_v27, %v65_v25  ;;  %v202_v29 = vpop.f32.mrb[1].mxu0 }
  0xf9   :  { %v203_v30 = vadd.f32 %v202_v29, %v69_v26  ;;  %v204_v31 = vpop.f32.mrb[2].mxu0 }
  0xfa   :  { %vm248_vm1 = vcmp.gt.f32.partialorder %v201_v28, 0.0  ;;  %v252_v32 = vmul.f32 0.2, %v201_v28  ;;  %v205_v33 = vpop.f32.mrb[3].mxu0 }
  0xfb   :  { %vm249_vm2 = vcmp.gt.f32.partialorder %v203_v30, 0.0  ;;  %v253_v34 = vmul.f32 0.2, %v203_v30 }
  0xfc   :  { %v256_v35 = vsel %vm248_vm1, %v201_v28, %v252_v32 }
  0xfd   :  { %v257_v36 = vsel %vm249_vm2, %v203_v30, %v253_v34  ;;  %v260_v39 = vpack.c.bf16 %v256_v35, %v256_v35 }
  0xfe   :  { %v261_v37 = vpack.c.bf16 %v257_v36, %v257_v36 }
 0x100   :  { %692 = vmatprep.mubr.bf16.mxu1 %v261_v37 }
 0x101   :  { %693 = vmatmul.mubr.bf16.vlgmr.msra.gmra.mrb[0].mxu1 %v260_v39 }
 0x102   :  { %1042 = vmatpush3.bf16.msra.mxu1 %v1193_v38 }
 0x103   :  { %1043 = vmatprep.subr.bf16.mxu1 %v1194_v40 }
 0x106   :  { %1044 = vmatpush3.bf16.msra.mxu1 %v1195_v43 }
 0x107   :  { %v241_v46 = vpop.f32.mrb[4].mxu0  ;;  %1045 = vmatprep.subr.bf16.mxu1 %v1196_v58 }
 0x108   :  { %v242_v47 = vadd.f32 %v241_v46, %v73_v44  ;;  %v243_v48 = vpop.f32.mrb[5].mxu0 }
 0x109   :  { %v244_v49 = vadd.f32 %v243_v48, %v77_v45  ;;  %v245_v50 = vpop.f32.mrb[6].mxu0 }
 0x10a   :  { %vm250_vm3 = vcmp.gt.f32.partialorder %v242_v47, 0.0  ;;  %v254_v51 = vmul.f32 0.2, %v242_v47  ;;  %v246_v52 = vpop.f32.mrb[7].mxu0  ;;  %1046 = vmatpush3.bf16.msra.mxu1 %v1197_v59 }
 0x10b   :  { %vm251_vm4 = vcmp.gt.f32.partialorder %v244_v49, 0.0  ;;  %v255_v53 = vmul.f32 0.2, %v244_v49  ;;  %1047 = vmatprep.subr.bf16.mxu1 %v1198_v60 }
 0x10c   :  { %v258_v54 = vsel %vm250_vm3, %v242_v47, %v254_v51 }
 0x10d   :  { %v259_v55 = vsel %vm251_vm4, %v244_v49, %v255_v53  ;;  %v262_v57 = vpack.c.bf16 %v258_v54, %v258_v54 }
 0x10e   :  { %v263_v56 = vpack.c.bf16 %v259_v55, %v259_v55  ;;  %1048 = vmatpush3.bf16.msra.mxu1 %v1199_v61 }
 0x10f   :  { %1049 = vmatprep.subr.bf16.mxu1 %v1200_v62 }
 0x110   :  { %733 = vmatprep.mubr.bf16.mxu0 %v263_v56 }
 0x111   :  { %734 = vmatmul.mubr.bf16.vlgmr.msra.gmra.mrb[8].mxu0 %v262_v57 }
 0x112   :  { %1050 = vmatpush3.bf16.msra.mxu1 %v1201_v63 }
 0x113   :  { %1051 = vmatprep.subr.bf16.mxu1 %v1202_v0 }
 0x116   :  { %1052 = vmatpush3.bf16.msra.mxu1 %v1203_v1 }
 0x117   :  { %1053 = vmatprep.subr.bf16.mxu1 %v1204_v2 }
 0x11a   :  { %1054 = vmatpush3.bf16.msra.mxu1 %v1205_v3 }
 0x11b   :  { %1055 = vmatprep.subr.bf16.mxu1 %v1206_v4 }
 0x11e   :  { %1056 = vmatpush3.bf16.msra.mxu1 %v1207_v5 }
 0x1d4   :  { %v694_v6 = vpop.f32.mrb[0].mxu1 }
 0x1d5   :  { %v696_v7 = vpop.f32.mrb[1].mxu1  ;;  %v695_v13 = vadd.f32 %v694_v6, %v333_v11 }
 0x1d6   :  { %v698_v8 = vpop.f32.mrb[2].mxu1  ;;  %v697_v14 = vadd.f32 %v696_v7, %v337_v12 }
 0x1d7   :  { %v699_v9 = vpop.f32.mrb[3].mxu1 }
 0x1e4   :  { %v735_v15 = vpop.f32.mrb[8].mxu0 }
 0x1e5   :  { %v736_v16 = vadd.f32 %v735_v15, %v695_v13  ;;  %v737_v17 = vpop.f32.mrb[9].mxu0 }
 0x1e6   :  { %v738_v18 = vadd.f32 %v737_v17, %v697_v14  ;;  %v739_v19 = vpop.f32.mrb[10].mxu0 }
 0x1e7   :  { %vm742_vm5 = vcmp.gt.f32.partialorder %v736_v16, 0.0  ;;  %v744_v20 = vmul.f32 0.2, %v736_v16  ;;  %v740_v23 = vpop.f32.mrb[11].mxu0 }
 0x1e8   :  { %vm743_vm6 = vcmp.gt.f32.partialorder %v738_v18, 0.0  ;;  %v745_v25 = vmul.f32 0.2, %v738_v18 }
 0x1e9   :  { %v746_v26 = vsel %vm742_vm5, %v736_v16, %v744_v20 }
 0x1ea   :  { %v747_v27 = vsel %vm743_vm6, %v738_v18, %v745_v25  ;;  %v748_v29 = vpack.c.bf16 %v746_v26, %v746_v26 }
 0x1eb   :  { %v749_v28 = vpack.c.bf16 %v747_v27, %v747_v27 }
 0x1ed   :  { %917 = vmatprep.mubr.bf16.mxu1 %v749_v28 }
 0x1ee   :  { %918 = vmatmul.mubr.bf16.vlgmr.msra.gmra.mrb[4].mxu1 %v748_v29 }
 0x2c1   :  { %v1057_v21 = vpop.f32.mrb[4].mxu1 }
 0x2c2   :  { %v1058_v24 = vpop.f32.mrb[5].mxu1 }
 0x2c3   :  { %v1059_v30 = vadd.f32 %v1058_v24, %v1057_v21  ;;  %v1060_v31 = vpop.f32.mrb[6].mxu1 }
 0x2c4   :  { %v1061_v32 = vpop.f32.mrb[7].mxu1 }
 0x2c5   :  { %v920_v33 = vadd.f32 %v1059_v30, %v1024_v22 }
 0x2c7   :  { %926 = vst.msk [vmem:[#allocation5] sm:$0xff] %vm925_vm7, %v920_v33 }
 0x2c8   :  { %1241 = shalt.err (!%p1238_p12)
}
 0x2c9   :  { %s1242_s6 = scalar_lea.hbm %s1456_s7, 128 }
 0x2ca   :  { %p1243_p13 = scmp.ne.s32.totalorder %s1456_s7, %s1242_s6  ;;  %p1246_p0 = scmp.lt.u32.totalorder %s1242_s6, %s1456_s7 }
 0x2cc   :  { %p1248_p1 = pnand %p1246_p0, %p1243_p13 }
 0x2ce   :  { %1251 = shalt.err (!%p1248_p1)
}
 0x2cf   :  { %936 = dma.vmem_to_hbm [thread:$0]  %s934_s8, 128, %s1456_s7, [#allocation4]  }
 0x2d0   :  { %1254 = dma.done.wait [#allocation4], 128  }
 0x2d1   :  { %1255 = vsyncadd [#allocation4], 4294967168 }
 0x2d2   :  { %940 = vsyncpa [#allocation3], 1 }
 0x2d3   :  { %941 = vsyncpa [#allocation4], 1 }

</bundles_post_ra>
